<compile_context>
chip_gen: v6e
topology: v6e:2x2x1
jax: 0.10.0
libtpu: 0.0.40
codegen_flags: <defaults>
</compile_context>

<pallas_src>
import math

import jax
import jax.numpy as jnp
from jax.experimental import pallas as pl
from jax.experimental.pallas import tpu as pltpu


def _cov_kernel(os_ref, xr_ref, xct_ref, ub_col_ref, u_row_ref, cov_ref):
    # os_ref (SMEM): [outputscale_alpha]
    os_a = os_ref[0]

    xr = xr_ref[...]            # (TM, D)  row-side points, pre-scaled by 1/(ls*sqrt(2))
    xct = xct_ref[...]          # (D, TN)  column-side points (lane-dense transposed layout)
    tm, d = xr.shape
    tn = xct.shape[1]

    # Per-feature squared distance on the VPU (D is a trace-time constant; loop unrolled).
    # Direct differences -> no gram-trick catastrophic cancellation.
    diff = xr[:, 0:1] - xct[0:1, :]          # (TM,1) - (1,TN) -> (TM,TN)
    d2 = diff * diff
    for k in range(1, d):
        diff = xr[:, k:k + 1] - xct[k:k + 1, :]
        d2 = d2 + diff * diff

    # Fused covariance tile:
    #   (c_beta * u_i) * u_j  +  os_a * exp(-||(x_i - x_j)/(ls*sqrt(2))||^2)
    cov_ref[...] = ub_col_ref[...] * u_row_ref[...] + os_a * jnp.exp(-d2)

    # 1e-8 jitter only where the tile intersects the global diagonal.
    i = pl.program_id(0)
    j = pl.program_id(1)
    row0 = i * tm
    col0 = j * tn

    @pl.when(jnp.logical_and(row0 < col0 + tn, col0 < row0 + tm))
    def _():
        rr = row0 + jax.lax.broadcasted_iota(jnp.int32, (tm, 1), 0)
        cc = col0 + jax.lax.broadcasted_iota(jnp.int32, (1, tn), 1)
        cov_ref[...] = cov_ref[...] + jnp.where(
            rr == cc, jnp.float32(1e-8), jnp.float32(0.0))


def _round_up(a, b):
    return ((a + b - 1) // b) * b


def _choose_tiles(n, tm, tn):
    # Sublane dim multiple of 8, lane dim multiple of 128 (lane-dense, unmasked stores).
    tm = max(8, _round_up(min(tm, n), 8))
    tn = max(128, _round_up(min(tn, n), 128))
    # Guarantee >= 2 grid steps along a "parallel" axis so v7x's two TensorCores both
    # get work (also doubles available EUP exp throughput).
    if pl.cdiv(n, tm) < 2 and pl.cdiv(n, tn) < 2 and n > 8:
        tm = max(8, _round_up(pl.cdiv(n, 2), 8))
    return tm, tn


def linearizing_control_3_forward(x, u, params, *, tm=512, tn=512):
    """x: (N, D) f32, u: (N,) f32,
    params: (4,) f32 = [lengthscale_alpha, outputscale_alpha, constant_beta_kernel, const_mean_beta].
    Returns (mean (N,), covar (N, N))."""
    x = x.astype(jnp.float32)
    u = u.astype(jnp.float32)
    params = params.astype(jnp.float32)
    n, d = x.shape

    ls_a, os_a, c_b, mu_b = params[0], params[1], params[2], params[3]

    tm, tn = _choose_tiles(n, tm, tn)
    grid = (pl.cdiv(n, tm), pl.cdiv(n, tn))

    # O(N·D) / O(N) hoists (legitimate: strictly smaller than the N^2 kernel work):
    #   exp(-0.5*||xi-xj||^2/ls^2) == exp(-||(xi-xj) * (1/(ls*sqrt(2)))||^2)
    xs = x * (1.0 / (ls_a * math.sqrt(2.0)))            # (N, D) pre-scaled rows
    xs_t = xs.T                                          # (D, N) lane-dense column layout
    ub_col = (c_b * u).reshape(n, 1)                     # c_beta folded into the u column
    u_row = u.reshape(1, n)
    os_param = os_a.reshape(1)                           # SMEM scalar

    cost = pl.CostEstimate(
        flops=int((3 * d + 4) * n * n),
        transcendentals=int(n * n),
        bytes_accessed=int(4 * n * n + 8 * n * d + 8 * n),
    )

    covar = pl.pallas_call(
        _cov_kernel,
        out_shape=jax.ShapeDtypeStruct((n, n), jnp.float32),
        grid=grid,
        in_specs=[
            pl.BlockSpec(memory_space=pltpu.MemorySpace.SMEM),    # [outputscale_alpha]
            pl.BlockSpec((tm, d), lambda i, j: (i, 0)),           # scaled x rows   (TM, D)
            pl.BlockSpec((d, tn), lambda i, j: (0, j)),           # scaled x^T cols (D, TN)
            pl.BlockSpec((tm, 1), lambda i, j: (i, 0)),           # c_beta * u column block
            pl.BlockSpec((1, tn), lambda i, j: (0, j)),           # u row block
        ],
        out_specs=pl.BlockSpec((tm, tn), lambda i, j: (i, j)),
        compiler_params=pltpu.CompilerParams(
            dimension_semantics=("parallel", "parallel"),
            vmem_limit_bytes=32 * 1024 * 1024,
        ),
        cost_estimate=cost,
    )(os_param, xs, xs_t, ub_col, u_row)

    # mean = alpha.mean (ZeroMean) + beta.mean (ConstantMean) * u  -- O(N), in the wrapper.
    mean = mu_b * u
    return mean, covar


def _reference(x, u, params):
    ls_a, os_a, c_b, mu_b = [params[i] for i in range(4)]
    n = x.shape[0]
    d2 = jnp.sum((x[:, None, :] - x[None, :, :]) ** 2, axis=-1)
    k_a = os_a * jnp.exp(-0.5 * d2 / (ls_a * ls_a))
    k_b = c_b * jnp.ones((n, n), jnp.float32)
    mean = mu_b * u
    covar = u[None, :] * k_b * u[:, None] + k_a + 1e-8 * jnp.eye(n, dtype=jnp.float32)
    return mean, covar


if __name__ == "__main__":
    N, D = 300, 2  # N not a tile multiple -> exercises ragged edge tiles (no padding/slice)
    key = jax.random.PRNGKey(0)
    kx, ku = jax.random.split(key)
    x = jax.random.normal(kx, (N, D), dtype=jnp.float32)
    u = jax.random.normal(ku, (N,), dtype=jnp.float32)

    # [lengthscale_alpha, outputscale_alpha, constant_beta_kernel, const_mean_beta]
    params = jnp.array([0.8, 1.2, 0.6, -0.4], dtype=jnp.float32)

    mean_ref, covar_ref = _reference(x, u, params)

    # Small tiles: 3x3 grid, exercises off-diagonal tiles and the diagonal-jitter gate.
    mean, covar = linearizing_control_3_forward(x, u, params, tm=128, tn=128)
    jax.block_until_ready((mean, covar))
    assert jnp.allclose(mean, mean_ref, rtol=1e-5, atol=1e-5)
    assert jnp.allclose(covar, covar_ref, rtol=1e-5, atol=1e-5)

    # Default (large-tile) path: exercises the 2-TensorCore grid clamp and ragged stores.
    mean2, covar2 = linearizing_control_3_forward(x, u, params)
    jax.block_until_ready((mean2, covar2))
    assert jnp.allclose(mean2, mean_ref, rtol=1e-5, atol=1e-5)
    assert jnp.allclose(covar2, covar_ref, rtol=1e-5, atol=1e-5)

    print("KERNEL_OK")
</pallas_src>

<mosaic_0001>
module attributes {stable_mosaic.version = 11 : i64} {
  func.func @_cov_kernel(%arg0: i32, %arg1: i32, %arg2: memref<1xf32, #tpu.memory_space<smem>>, %arg3: memref<128x2xf32, #tpu.memory_space<vmem>>, %arg4: memref<2x128xf32, #tpu.memory_space<vmem>>, %arg5: memref<128x1xf32, #tpu.memory_space<vmem>>, %arg6: memref<1x128xf32, #tpu.memory_space<vmem>>, %arg7: memref<128x128xf32, #tpu.memory_space<vmem>>) attributes {dimension_semantics = [#tpu.dimension_semantics<parallel>, #tpu.dimension_semantics<parallel>], iteration_bounds = array<i64: 3, 3>, scalar_prefetch = 0 : i64, scratch_operands = 0 : i64, tpu.core_type = #tpu.core_type<tc>, window_params = [{transform_indices = @transform_0, window_bounds = array<i64: 1>}, {transform_indices = @transform_1, window_bounds = array<i64: 128, 2>}, {transform_indices = @transform_2, window_bounds = array<i64: 2, 128>}, {transform_indices = @transform_3, window_bounds = array<i64: 128, 1>}, {transform_indices = @transform_4, window_bounds = array<i64: 1, 128>}, {transform_indices = @transform_5, window_bounds = array<i64: 128, 128>}]} {
    %c0 = arith.constant 0 : index
    %0 = memref.load %arg2[%c0] : memref<1xf32, #tpu.memory_space<smem>>
    %c0_0 = arith.constant 0 : index
    %c0_1 = arith.constant 0 : index
    %1 = vector.load %arg3[%c0_0, %c0_1] : memref<128x2xf32, #tpu.memory_space<vmem>>, vector<128x2xf32>
    %c0_2 = arith.constant 0 : index
    %c0_3 = arith.constant 0 : index
    %2 = vector.load %arg4[%c0_2, %c0_3] : memref<2x128xf32, #tpu.memory_space<vmem>>, vector<2x128xf32>
    %3 = vector.extract_strided_slice %1 {offsets = [0, 0], sizes = [128, 1], strides = [1, 1]} : vector<128x2xf32> to vector<128x1xf32>
    %4 = vector.extract_strided_slice %2 {offsets = [0, 0], sizes = [1, 128], strides = [1, 1]} : vector<2x128xf32> to vector<1x128xf32>
    %5 = vector.broadcast %3 : vector<128x1xf32> to vector<128x128xf32>
    %6 = vector.broadcast %4 : vector<1x128xf32> to vector<128x128xf32>
    %7 = arith.subf %5, %6 : vector<128x128xf32>
    %8 = arith.mulf %7, %7 : vector<128x128xf32>
    %9 = vector.extract_strided_slice %1 {offsets = [0, 1], sizes = [128, 1], strides = [1, 1]} : vector<128x2xf32> to vector<128x1xf32>
    %10 = vector.extract_strided_slice %2 {offsets = [1, 0], sizes = [1, 128], strides = [1, 1]} : vector<2x128xf32> to vector<1x128xf32>
    %11 = vector.broadcast %9 : vector<128x1xf32> to vector<128x128xf32>
    %12 = vector.broadcast %10 : vector<1x128xf32> to vector<128x128xf32>
    %13 = arith.subf %11, %12 : vector<128x128xf32>
    %14 = arith.mulf %13, %13 : vector<128x128xf32>
    %15 = arith.addf %8, %14 : vector<128x128xf32>
    %c0_4 = arith.constant 0 : index
    %c0_5 = arith.constant 0 : index
    %16 = vector.load %arg5[%c0_4, %c0_5] : memref<128x1xf32, #tpu.memory_space<vmem>>, vector<128x1xf32>
    %c0_6 = arith.constant 0 : index
    %c0_7 = arith.constant 0 : index
    %17 = vector.load %arg6[%c0_6, %c0_7] : memref<1x128xf32, #tpu.memory_space<vmem>>, vector<1x128xf32>
    %18 = vector.broadcast %16 : vector<128x1xf32> to vector<128x128xf32>
    %19 = vector.broadcast %17 : vector<1x128xf32> to vector<128x128xf32>
    %20 = arith.mulf %18, %19 : vector<128x128xf32>
    %cst = arith.constant 0.000000e+00 : f32
    %21 = vector.broadcast %cst : f32 to vector<128x128xf32>
    %22 = arith.subf %21, %15 : vector<128x128xf32>
    %23 = math.exp %22 : vector<128x128xf32>
    %24 = vector.broadcast %0 : f32 to vector<128x128xf32>
    %25 = arith.mulf %24, %23 : vector<128x128xf32>
    %26 = arith.addf %20, %25 : vector<128x128xf32>
    %c0_8 = arith.constant 0 : index
    %c0_9 = arith.constant 0 : index
    %27 = vector.load %arg7[%c0_8, %c0_9] : memref<128x128xf32, #tpu.memory_space<vmem>>, vector<128x128xf32>
    tpu.vector_store %arg7[%c0_8, %c0_9], %26 {strides = array<i32>} : memref<128x128xf32, #tpu.memory_space<vmem>>, vector<128x128xf32>,
    %c128_i32 = arith.constant 128 : i32
    %28 = arith.muli %arg0, %c128_i32 : i32
    %c128_i32_10 = arith.constant 128 : i32
    %29 = arith.muli %arg1, %c128_i32_10 : i32
    %c128_i32_11 = arith.constant 128 : i32
    %30 = arith.addi %29, %c128_i32_11 : i32
    %31 = arith.cmpi slt, %28, %30 : i32
    %c128_i32_12 = arith.constant 128 : i32
    %32 = arith.addi %28, %c128_i32_12 : i32
    %33 = arith.cmpi slt, %29, %32 : i32
    %34 = arith.andi %31, %33 : i1
    %35 = arith.extui %34 : i1 to i32
    %c0_i32 = arith.constant 0 : i32
    %36 = arith.cmpi ne, %35, %c0_i32 : i32
    scf.if %36 {
      %37 = tpu.iota {dimensions = array<i32: 0>} : vector<128x1xi32>
      %38 = vector.broadcast %28 : i32 to vector<128x1xi32>
      %39 = arith.addi %38, %37 : vector<128x1xi32>
      %40 = tpu.iota {dimensions = array<i32: 1>} : vector<1x128xi32>
      %41 = vector.broadcast %29 : i32 to vector<1x128xi32>
      %42 = arith.addi %41, %40 : vector<1x128xi32>
      %c0_13 = arith.constant 0 : index
      %c0_14 = arith.constant 0 : index
      %43 = vector.load %arg7[%c0_13, %c0_14] : memref<128x128xf32, #tpu.memory_space<vmem>>, vector<128x128xf32>
      %44 = vector.broadcast %39 : vector<128x1xi32> to vector<128x128xi32>
      %45 = vector.broadcast %42 : vector<1x128xi32> to vector<128x128xi32>
      %46 = arith.cmpi eq, %44, %45 : vector<128x128xi32>
      %cst_15 = arith.constant 9.99999993E-9 : f32
      %cst_16 = arith.constant 0.000000e+00 : f32
      %47 = vector.broadcast %cst_15 : f32 to vector<128x128xf32>
      %48 = vector.broadcast %cst_16 : f32 to vector<128x128xf32>
      %49 = arith.select %46, %47, %48 : vector<128x128xi1>, vector<128x128xf32>
      %50 = arith.addf %43, %49 : vector<128x128xf32>
      %c0_17 = arith.constant 0 : index
      %c0_18 = arith.constant 0 : index
      %51 = vector.load %arg7[%c0_17, %c0_18] : memref<128x128xf32, #tpu.memory_space<vmem>>, vector<128x128xf32>
      tpu.vector_store %arg7[%c0_17, %c0_18], %50 {strides = array<i32>} : memref<128x128xf32, #tpu.memory_space<vmem>>, vector<128x128xf32>,
    } else {
    }
    return
  }
  func.func @transform_0(%arg0: i32, %arg1: i32) -> i32 {
    %c0_i32 = arith.constant 0 : i32
    %c0_i32_0 = arith.constant 0 : i32
    return %c0_i32 : i32
  }
  func.func @transform_1(%arg0: i32, %arg1: i32) -> (i32, i32) {
    %c0_i32 = arith.constant 0 : i32
    %c0_i32_0 = arith.constant 0 : i32
    return %arg0, %c0_i32 : i32, i32
  }
  func.func @transform_2(%arg0: i32, %arg1: i32) -> (i32, i32) {
    %c0_i32 = arith.constant 0 : i32
    %c0_i32_0 = arith.constant 0 : i32
    return %c0_i32, %arg1 : i32, i32
  }
  func.func @transform_3(%arg0: i32, %arg1: i32) -> (i32, i32) {
    %c0_i32 = arith.constant 0 : i32
    %c0_i32_0 = arith.constant 0 : i32
    return %arg0, %c0_i32 : i32, i32
  }
  func.func @transform_4(%arg0: i32, %arg1: i32) -> (i32, i32) {
    %c0_i32 = arith.constant 0 : i32
    %c0_i32_0 = arith.constant 0 : i32
    return %c0_i32, %arg1 : i32, i32
  }
  func.func @transform_5(%arg0: i32, %arg1: i32) -> (i32, i32) {
    %c0_i32 = arith.constant 0 : i32
    return %arg0, %arg1 : i32, i32
  }
}

</mosaic_0001>

<bundles_post_ra>
// kernel: tpu_custom_call.1
= control target key start
LH: loop header
LB: loop body
LE: loop exit
PB: predicated region body
PF: predicated region fallthrough
CT: control target
= control target key end

     0   :  { %s1800_s0 = inlined_call_operand.<no memory space> [shape: f32[1], index: 0, kind: input, shape index: {}]   ;;  %s1801_s1 = inlined_call_operand.vmem [shape: f32[300,2], index: 1, kind: input, shape index: {}]   ;;  %s1802_s2 = inlined_call_operand.vmem [shape: f32[2,300], index: 2, kind: input, shape index: {}]   ;;  %s1803_s3 = inlined_call_operand.vmem [shape: f32[300,1], index: 3, kind: input, shape index: {}]   ;;  %s1804_s4 = inlined_call_operand.vmem [shape: f32[1,300], index: 4, kind: input, shape index: {}]   ;;  %s1805_s5 = inlined_call_operand.hbm [shape: f32[300,300], index: 5, kind: output, shape index: {}]  }
   0x1   :  { %10 = sst [smem:[#allocation2]] %s1800_s0 }
   0x2   :  { %11 = vsyncpa [#allocation4], 0 }
   0x3   :  { %13 = vsyncpa [#allocation4 + $0x1], 0  ;;  %s1334_s20 = smov 0   ;;  %s1336_s21 = smov 0  }
   0x4   :  { %s1338_s22 = smov 0   ;;  %s1340_s23 = smov 0  }
   0x5   :  { %s1342_s24 = smov 0   ;;  %s1344_s25 = smov 0  }
   0x6   :  { %s1346_s26 = smov 0   ;;  %s1348_s27 = smov 0  }
   0x7 LB: > { %s1062_s0 = sadd.s32 4294967295, %s1292_s27   ;;  %s1063_s28 = sadd.s32 4294967294, %s1292_s27   ;;  %s1292_s27 = sphi %s1348_s27, %s19_s27   ;;  %s1288_s26 = sphi %s1346_s26, %s1816_s26   ;;  %s1284_s25 = sphi %s1344_s25, %s1815_s25   ;;  %s1280_s24 = sphi %s1342_s24, %s1814_s24   ;;  %s1276_s23 = sphi %s1340_s23, %s1813_s23   ;;  %s1272_s22 = sphi %s1338_s22, %s1812_s22   ;;  %s1268_s21 = sphi %s1336_s21, %s1811_s21   ;;  %s1264_s20 = sphi %s1334_s20, %s1810_s20  }
   0x8   : > { %s28_s29 = sadd.s32 1, %s1284_s25  ;;  %s31_s30 = sadd.s32 1, %s1288_s26 }
   0x9   : > { %p29_p0 = scmp.ge.s32.totalorder %s28_s29, 3  ;;  %p175_p1 = scmp.ne.s32.totalorder %s1272_s22, %s1268_s21 }
   0xa   : > { %p176_p2 = scmp.eq.s32.totalorder %s1062_s0, 8  ;;  %p181_p5 = scmp.ne.s32.totalorder %s1268_s21, %s1264_s20 }
   0xb   : > { %s1818_s29 = smov (%p29_p0, %s28_s29), 0  ;;  %s1820_s30 = smov (!%p29_p0, %s31_s30), %s1288_s26 }
   0xc   : > { %s161_s6 = ssub.s32 %s1284_s25, %s1818_s29  ;;  %p1385_p3 = por %p176_p2, %p175_p1 }
   0xd   : > { %p33_p4 = scmp.ge.s32.totalorder %s1820_s30, 3  ;;  %p182_p6 = scmp.eq.s32.totalorder %s1063_s28, 8 }
   0xe   : > { %p1066_p7 = scmp.ge.s32.totalorder %s1292_s27, 1  ;;  %p250_p9 = scmp.lt.s32.totalorder %s1292_s27, 10 }
   0xf   : > { %s1822_s30 = smov (%p33_p4, %s1820_s30), 0  ;;  %p1394_p8 = por %p182_p6, %p181_p5 }
  0x10   : > { %s160_s9 = ssub.s32 %s1288_s26, %s1822_s30  ;;  %s165_s10 = sadd.s32 1, %s1272_s22 }
  0x11   : > { %s162_s11 = sor.u32 %s161_s6, %s160_s9  ;;  %p251_p10 = pnand %p1066_p7, %p250_p9 }
  0x12   : > { %p163_p11 = scmp.eq.s32.totalorder %s162_s11, 0  ;;  %s1406_s13 = sshll.u32 (!%p251_p10), %s1280_s24, 4 }
  0x13   : > { %254 = sbr.rel (%p251_p10) target bundleno = 315 (0x13b), region = 40  ;;  %p303_p12 = scmp.lt.s32.totalorder (!%p251_p10), %s1406_s13, 37 }
  0x14   : > { %s1403_s12 = scalar_select %p163_p11, %s1272_s22, %s165_s10  }
  0x15   : > { %s1460_s6 = sshll.u32 (!%p251_p10), %s1280_s24, 7  ;;  %s1463_s9 = sshll.u32 (!%p251_p10), %s1276_s23, 7 }
  0x16   : > { %s806_s10 = sadd.s32 (!%p251_p10), 128, %s1463_s9  ;;  %s808_s11 = sadd.s32 (!%p251_p10), 128, %s1460_s6 }
  0x17   : > { %p1468_p13 = scmp.lt.s32.totalorder (!%p251_p10), %s1460_s6, %s806_s10  ;;  %p1473_p0 = scmp.lt.s32.totalorder (!%p251_p10), %s1463_s9, %s808_s11 }
  0x18   : > { %v1294_v0 = vmov 1   ;;  %v1295_v1 = vmov 0   ;;  %s1410_s14 = scalar_select %p303_p12, %s1406_s13, 37  ;;  %v436_v42 = vlaneseq }
  0x19   : > { %1164 = vset.pattern.permute.xlu0 %v1294_v0  ;;  %1163 = vset.pattern.permute.xlu1 %v1295_v1  ;;  %p810_p1 = pnand %p1473_p0, %p1468_p13  ;;  %p312_p2 = scmp.lt.s32.totalorder %s1276_s23, 2 }
  0x1a   : > { %s1069_s15 = sshll.u32 %s1410_s14, 3  ;;  %v1489_v45 = vshrl.u32 %v436_v42, 7 }
  0x1b   : > { %s1418_s18 = scalar_lea.vmem %s1801_s1, %s1069_s15  ;;  %s1441_s28 = scalar_lea.vmem %s1803_s3, %s1069_s15 }
  0x1c   : > { %v341_v2 = vld [vmem:[%s1418_s18 + $0x10] sm:$0xff]  ;;  %v339_v3 = vld [vmem:[%s1418_s18] sm:$0xff]  ;;  %v342_v4 = vld [vmem:[%s1418_s18 + $0x18] sm:$0xff]  ;;  %s1483_s16 = scalar_select %p312_p2, %s1276_s23, 2  ;;  %v538_v46 = vsub.s32 1, %v1489_v45  ;;  %v438_v49 = vsub.s32 0, %v1489_v45 }
  0x1d   : > { %368 = vperm.xlu1 %1163, %v341_v2   ;;  %473 = vperm.xlu0 %1164, %v339_v3   ;;  %v344_v5 = vld [vmem:[%s1418_s18 + $0x28] sm:$0xff]  ;;  %v346_v6 = vld [vmem:[%s1418_s18 + $0x38] sm:$0xff]  ;;  %v343_v12 = vld [vmem:[%s1418_s18 + $0x20] sm:$0xff] }
  0x1e   : > { %v348_v7 = vld [vmem:[%s1418_s18 + $0x48] sm:$0xff]  ;;  %v350_v8 = vld [vmem:[%s1418_s18 + $0x58] sm:$0xff]  ;;  %v345_v13 = vld [vmem:[%s1418_s18 + $0x30] sm:$0xff]  ;;  %s1070_s17 = sshll.u32 %s1483_s16, 1 }
  0x1f   : > { %v352_v9 = vld [vmem:[%s1418_s18 + $0x68] sm:$0xff]  ;;  %v354_v10 = vld [vmem:[%s1418_s18 + $0x78] sm:$0xff]  ;;  %v347_v14 = vld [vmem:[%s1418_s18 + $0x40] sm:$0xff]  ;;  %s315_s0 = scalar_lea.vmem %s1802_s2, %s1070_s17  ;;  %s332_s17 = scalar_lea.vmem %s1804_s4, %s1483_s16 }
  0x20   : > { %v340_v11 = vld [vmem:[%s1418_s18 + $0x8] sm:$0xff]  ;;  %v349_v15 = vld [vmem:[%s1418_s18 + $0x50] sm:$0xff]  ;;  %v351_v16 = vld [vmem:[%s1418_s18 + $0x60] sm:$0xff] }
  0x21   : > { %373 = vperm.xlu1 %1163, %v342_v4   ;;  %485 = vperm.xlu0 %1164, %v342_v4   ;;  %v353_v17 = vld [vmem:[%s1418_s18 + $0x70] sm:$0xff]  ;;  %v589_v18 = vld [vmem:[%s1441_s28 + $0x8] sm:$0xff]  ;;  %v588_v19 = vld [vmem:[%s1441_s28] sm:$0xff]  ;;  %s295_s18 = sand.u32 1, %s1268_s21  }
  0x22   : > { %v592_v20 = vld [vmem:[%s1441_s28 + $0x20] sm:$0xff]  ;;  %v590_v21 = vld [vmem:[%s1441_s28 + $0x10] sm:$0xff]  ;;  %v591_v23 = vld [vmem:[%s1441_s28 + $0x18] sm:$0xff]  ;;  %s1067_s16 = sshll.u32 %s295_s18, 7 }
  0x23   : > { %v594_v22 = vld [vmem:[%s1441_s28 + $0x30] sm:$0xff]  ;;  %v596_v24 = vld [vmem:[%s1441_s28 + $0x40] sm:$0xff]  ;;  %v593_v25 = vld [vmem:[%s1441_s28 + $0x28] sm:$0xff]  ;;  %s1571_s19 = scalar_lea.vmem [#allocation3], %s1067_s16 }
  0x24   : > { %v598_v26 = vld [vmem:[%s1441_s28 + $0x50] sm:$0xff]  ;;  %v595_v27 = vld [vmem:[%s1441_s28 + $0x38] sm:$0xff]  ;;  %v600_v28 = vld [vmem:[%s1441_s28 + $0x60] sm:$0xff] }
  0x25   : > { %383 = vperm.xlu1 %1163, %v344_v5   ;;  %493 = vperm.xlu0 %1164, %v344_v5   ;;  %v597_v29 = vld [vmem:[%s1441_s28 + $0x48] sm:$0xff]  ;;  %v602_v30 = vld [vmem:[%s1441_s28 + $0x70] sm:$0xff]  ;;  %v599_v31 = vld [vmem:[%s1441_s28 + $0x58] sm:$0xff] }
  0x26   : > { %v601_v32 = vld [vmem:[%s1441_s28 + $0x68] sm:$0xff]  ;;  %v603_v33 = vld [vmem:[%s1441_s28 + $0x78] sm:$0xff]  ;;  %v355_v50 = vld [vmem:[%s315_s0] sm:$0x3]  ;;  %s1539_s28 = sld [smem:[#allocation2]] }
  0x27   : > { %v1500_v51 = vrot.slane %v355_v50, %v538_v46  ;;  %v1506_v54 = vrot.slane %v355_v50, %v438_v49 }
  0x29   : > { %393 = vperm.xlu1 %1163, %v346_v6   ;;  %501 = vperm.xlu0 %1164, %v346_v6  }
  0x2d   : > { %403 = vperm.xlu1 %1163, %v348_v7   ;;  %509 = vperm.xlu0 %1164, %v348_v7  }
  0x31   : > { %413 = vperm.xlu1 %1163, %v350_v8   ;;  %517 = vperm.xlu0 %1164, %v350_v8  }
  0x35   : > { %423 = vperm.xlu1 %1163, %v352_v9   ;;  %525 = vperm.xlu0 %1164, %v352_v9  }
  0x39   : > { %433 = vperm.xlu1 %1163, %v354_v10   ;;  %533 = vperm.xlu0 %1164, %v354_v10  }
  0x3d   : > { %1165 = vset.pattern.permute.xlu1 %v1294_v0  ;;  %1166 = vset.pattern.permute.xlu0 %v1295_v1 }
  0x3e   : > { %477 = vperm.xlu1 %1165, %v340_v11   ;;  %358 = vperm.xlu0 %1166, %v339_v3  }
  0x42   : > { %481 = vperm.xlu1 %1165, %v341_v2   ;;  %363 = vperm.xlu0 %1166, %v340_v11  }
  0x46   : > { %489 = vperm.xlu1 %1165, %v343_v12   ;;  %378 = vperm.xlu0 %1166, %v343_v12  }
  0x4a   : > { %497 = vperm.xlu1 %1165, %v345_v13   ;;  %388 = vperm.xlu0 %1166, %v345_v13  }
  0x4e   : > { %505 = vperm.xlu1 %1165, %v347_v14   ;;  %398 = vperm.xlu0 %1166, %v347_v14  }
  0x52   : > { %513 = vperm.xlu1 %1165, %v349_v15   ;;  %408 = vperm.xlu0 %1166, %v349_v15  }
  0x56   : > { %521 = vperm.xlu1 %1165, %v351_v16   ;;  %418 = vperm.xlu0 %1166, %v351_v16  }
  0x5a   : > { %529 = vperm.xlu1 %1165, %v353_v17   ;;  %428 = vperm.xlu0 %1166, %v353_v17  }
  0x5e   : > { %1167 = vset.pattern.permute.xlu1 %v1295_v1  ;;  %612 = vperm.xlu0 %1166, %v589_v18  }
  0x5f   : > { %607 = vperm.xlu1 %1167, %v588_v19  }
  0x62   : > { %627 = vperm.xlu0 %1166, %v592_v20  }
  0x63   : > { %617 = vperm.xlu1 %1167, %v590_v21  }
  0x66   : > { %637 = vperm.xlu0 %1166, %v594_v22  }
  0x67   : > { %622 = vperm.xlu1 %1167, %v591_v23  }
  0x6a   : > { %647 = vperm.xlu0 %1166, %v596_v24  }
  0x6b   : > { %632 = vperm.xlu1 %1167, %v593_v25  }
  0x6e   : > { %657 = vperm.xlu0 %1166, %v598_v26  }
  0x6f   : > { %642 = vperm.xlu1 %1167, %v595_v27  }
  0x72   : > { %667 = vperm.xlu0 %1166, %v600_v28  }
  0x73   : > { %652 = vperm.xlu1 %1167, %v597_v29  }
  0x76   : > { %677 = vperm.xlu0 %1166, %v602_v30  }
  0x77   : > { %662 = vperm.xlu1 %1167, %v599_v31  }
  0x7b   : > { %672 = vperm.xlu1 %1167, %v601_v32  }
  0x7f   : > { %682 = vperm.xlu1 %1167, %v603_v33  }
  0x98   : > { %v369_v34 = vpop.permute.xlu1 %368  ;;  %v474_v35 = vpop.permute.xlu0 %473 }
  0x99   : > { %v540_v61 = vsub.f32 %v474_v35, %v1500_v51  ;;  %v442_v4 = vsub.f32 %v369_v34, %v1506_v54 }
  0x9b   : > { %v556_v5 = vmul.f32 %v540_v61, %v540_v61  ;;  %v458_v16 = vmul.f32 %v442_v4, %v442_v4 }
  0x9c   : > { %v374_v36 = vpop.permute.xlu1 %373  ;;  %v486_v37 = vpop.permute.xlu0 %485 }
  0x9d   : > { %v443_v55 = vsub.f32 %v374_v36, %v1506_v54  ;;  %v543_v56 = vsub.f32 %v486_v37, %v1500_v51 }
  0x9f   : > { %v459_v59 = vmul.f32 %v443_v55, %v443_v55  ;;  %v559_v60 = vmul.f32 %v543_v56, %v543_v56 }
  0xa0   : > { %v384_v38 = vpop.permute.xlu1 %383  ;;  %v494_v39 = vpop.permute.xlu0 %493 }
  0xa1   : > { %v575_v1 = vadd.f32 %v559_v60, %v459_v59  ;;  %v445_v10 = vsub.f32 %v384_v38, %v1506_v54  ;;  %v545_v17 = vsub.f32 %v494_v39, %v1500_v51 }
  0xa3   : > { %v710_v12 = vsub.f32 0.0, %v575_v1  ;;  %v461_v28 = vmul.f32 %v445_v10, %v445_v10  ;;  %v561_v31 = vmul.f32 %v545_v17, %v545_v17 }
  0xa4   : > { %v394_v40 = vpop.permute.xlu1 %393  ;;  %v502_v41 = vpop.permute.xlu0 %501 }
  0xa5   : > { %v447_v18 = vsub.f32 %v394_v40, %v1506_v54  ;;  %v547_v19 = vsub.f32 %v502_v41, %v1500_v51  ;;  %v729_v27 = vmul.f32 1.442695, %v710_v12  ;;  %v577_v59 = vadd.f32 %v561_v31, %v461_v28 }
  0xa7   : > { %v463_v32 = vmul.f32 %v447_v18, %v447_v18  ;;  %v563_v33 = vmul.f32 %v547_v19, %v547_v19  ;;  %1168 = vpow2.f32 %v729_v27 }
  0xa8   : > { %v404_v43 = vpop.permute.xlu1 %403  ;;  %v1485_v44 = vpop.permute.xlu0 %509 }
  0xa9   : > { %v449_v37 = vsub.f32 %v404_v43, %v1506_v54  ;;  %v549_v41 = vsub.f32 %v1485_v44, %v1500_v51  ;;  %v579_v60 = vadd.f32 %v563_v33, %v463_v32 }
  0xab   : > { %v714_v17 = vsub.f32 0.0, %v579_v60  ;;  %v1563_v60 = vstv %s1539_s28 }
  0xac   : > { %v1495_v47 = vpop.permute.xlu1 %413  ;;  %v1497_v48 = vpop.permute.xlu0 %517 }
  0xad   : > { %v737_v31 = vmul.f32 1.442695, %v714_v17 }
  0xb0   : > { %v1502_v52 = vpop.permute.xlu1 %423  ;;  %v1504_v53 = vpop.permute.xlu0 %525 }
  0xb4   : > { %v1510_v57 = vpop.permute.xlu1 %433  ;;  %v1512_v58 = vpop.permute.xlu0 %533 }
  0xb9   : > { %v478_v62 = vpop.permute.xlu1 %477  ;;  %v359_v63 = vpop.permute.xlu0 %358 }
  0xba   : > { %v440_v0 = vsub.f32 %v359_v63, %v1506_v54  ;;  %v541_v2 = vsub.f32 %v478_v62, %v1500_v51  ;;  %v465_v63 = vmul.f32 %v449_v37, %v449_v37 }
  0xbc   : > { %v456_v3 = vmul.f32 %v440_v0, %v440_v0  ;;  %v557_v13 = vmul.f32 %v541_v2, %v541_v2 }
  0xbd   : > { %v482_v6 = vpop.permute.xlu1 %481  ;;  %v364_v7 = vpop.permute.xlu0 %363 }
  0xbe   : > { %v542_v8 = vsub.f32 %v482_v6, %v1500_v51  ;;  %v441_v9 = vsub.f32 %v364_v7, %v1506_v54  ;;  %v572_v11 = vadd.f32 %v556_v5, %v456_v3  ;;  %v565_v3 = vmul.f32 %v549_v41, %v549_v41 }
  0xbf   : > { %v451_v5 = vsub.f32 %v1495_v47, %v1506_v54 }
  0xc0   : > { %v558_v14 = vmul.f32 %v542_v8, %v542_v8  ;;  %v457_v15 = vmul.f32 %v441_v9, %v441_v9  ;;  %v707_v24 = vsub.f32 0.0, %v572_v11  ;;  %v551_v9 = vsub.f32 %v1497_v48, %v1500_v51 }
  0xc1   : > { %v490_v20 = vpop.permute.xlu1 %489  ;;  %v379_v21 = vpop.permute.xlu0 %378  ;;  %v581_v18 = vadd.f32 %v565_v3, %v465_v63  ;;  %v467_v47 = vmul.f32 %v451_v5, %v451_v5 }
  0xc2   : > { %v573_v22 = vadd.f32 %v557_v13, %v457_v15  ;;  %v544_v23 = vsub.f32 %v490_v20, %v1500_v51  ;;  %v574_v25 = vadd.f32 %v558_v14, %v458_v16  ;;  %v444_v26 = vsub.f32 %v379_v21, %v1506_v54 }
  0xc3   : > { %v723_v46 = vmul.f32 1.442695, %v707_v24  ;;  %v712_v16 = vsub.f32 0.0, %v577_v59  ;;  %v567_v48 = vmul.f32 %v551_v9, %v551_v9  ;;  %v716_v32 = vsub.f32 0.0, %v581_v18  ;;  %v1560_v59 = vld [vmem:[%s332_s17] ss:$0 sm:$0xff] }
  0xc4   : > { %v708_v29 = vsub.f32 0.0, %v573_v22  ;;  %v560_v30 = vmul.f32 %v544_v23, %v544_v23  ;;  %v460_v34 = vmul.f32 %v444_v26, %v444_v26  ;;  %v709_v49 = vsub.f32 0.0, %v574_v25 }
  0xc5   : > { %v498_v35 = vpop.permute.xlu1 %497  ;;  %v389_v36 = vpop.permute.xlu0 %388  ;;  %v453_v22 = vsub.f32 %v1502_v52, %v1506_v54  ;;  %v553_v23 = vsub.f32 %v1504_v53, %v1500_v51  ;;  %v583_v53 = vadd.f32 %v567_v48, %v467_v47 }
  0xc6   : > { %v725_v38 = vmul.f32 1.442695, %v708_v29  ;;  %v546_v39 = vsub.f32 %v498_v35, %v1500_v51  ;;  %v446_v40 = vsub.f32 %v389_v36, %v1506_v54  ;;  %v576_v50 = vadd.f32 %v560_v30, %v460_v34  ;;  %v1551_v52 = vpop.eup %1168 }
  0xc7   : > { %v727_v44 = vmul.f32 1.442695, %v709_v49  ;;  %v733_v30 = vmul.f32 1.442695, %v712_v16  ;;  %v469_v36 = vmul.f32 %v453_v22, %v453_v22  ;;  %v569_v37 = vmul.f32 %v553_v23, %v553_v23 }
  0xc8   : > { %v562_v55 = vmul.f32 %v546_v39, %v546_v39  ;;  %v462_v56 = vmul.f32 %v446_v40, %v446_v40  ;;  %1170 = vpow2.f32 %v725_v38  ;;  %v711_v61 = vsub.f32 0.0, %v576_v50 }
  0xc9   : > { %v506_v62 = vpop.permute.xlu1 %505  ;;  %v399_v43 = vpop.permute.xlu0 %398  ;;  %1172 = vpow2.f32 %v723_v46 }
  0xca   : > { %v578_v0 = vadd.f32 %v562_v55, %v462_v56  ;;  %v548_v1 = vsub.f32 %v506_v62, %v1500_v51  ;;  %v448_v2 = vsub.f32 %v399_v43, %v1506_v54  ;;  %v731_v4 = vmul.f32 1.442695, %v711_v61 }
  0xcb   : > { %v455_v55 = vsub.f32 %v1510_v57, %v1506_v54  ;;  %v555_v56 = vsub.f32 %v1512_v58, %v1500_v51 }
  0xcc   : > { %v713_v6 = vsub.f32 0.0, %v578_v0  ;;  %v564_v7 = vmul.f32 %v548_v1, %v548_v1  ;;  %v464_v8 = vmul.f32 %v448_v2, %v448_v2  ;;  %1174 = vpow2.f32 %v731_v4 }
  0xcd   : > { %v514_v10 = vpop.permute.xlu1 %513  ;;  %v409_v11 = vpop.permute.xlu0 %408  ;;  %1176 = vpow2.f32 %v727_v44  ;;  %v741_v0 = vmul.f32 1.442695, %v716_v32  ;;  %v718_v1 = vsub.f32 0.0, %v583_v53  ;;  %v585_v2 = vadd.f32 %v569_v37, %v469_v36 }
  0xce   : > { %v735_v12 = vmul.f32 1.442695, %v713_v6  ;;  %v580_v13 = vadd.f32 %v564_v7, %v464_v8  ;;  %v550_v14 = vsub.f32 %v514_v10, %v1500_v51  ;;  %v450_v15 = vsub.f32 %v409_v11, %v1506_v54 }
  0xcf   : > { %v471_v5 = vmul.f32 %v455_v55, %v455_v55  ;;  %v571_v6 = vmul.f32 %v555_v56, %v555_v56 }
  0xd0   : > { %v715_v19 = vsub.f32 0.0, %v580_v13  ;;  %v566_v20 = vmul.f32 %v550_v14, %v550_v14  ;;  %v466_v21 = vmul.f32 %v450_v15, %v450_v15  ;;  %1178 = vpow2.f32 %v735_v12 }
  0xd1   : > { %v522_v24 = vpop.permute.xlu1 %521  ;;  %v419_v25 = vpop.permute.xlu0 %418  ;;  %v745_v12 = vmul.f32 1.442695, %v718_v1 }
  0xd2   : > { %v739_v26 = vmul.f32 1.442695, %v715_v19  ;;  %v582_v27 = vadd.f32 %v566_v20, %v466_v21  ;;  %v552_v28 = vsub.f32 %v522_v24, %v1500_v51  ;;  %v452_v29 = vsub.f32 %v419_v25, %v1506_v54 }
  0xd3   : > { %v720_v19 = vsub.f32 0.0, %v585_v2  ;;  %v587_v20 = vadd.f32 %v571_v6, %v471_v5 }
  0xd4   : > { %v717_v33 = vsub.f32 0.0, %v582_v27  ;;  %v568_v34 = vmul.f32 %v552_v28, %v552_v28  ;;  %v468_v35 = vmul.f32 %v452_v29, %v452_v29  ;;  %1180 = vpow2.f32 %v739_v26 }
  0xd5   : > { %v530_v38 = vpop.permute.xlu1 %529  ;;  %v429_v39 = vpop.permute.xlu0 %428  ;;  %1182 = vpow2.f32 %v733_v30  ;;  %v759_v29 = vmul.f32 %v1551_v52, %v1563_v60  ;;  %v749_v30 = vmul.f32 1.442695, %v720_v19 }
  0xd6   : > { %v1171_v40 = vpop.eup %1170  ;;  %v743_v41 = vmul.f32 1.442695, %v717_v33  ;;  %v584_v46 = vadd.f32 %v568_v34, %v468_v35  ;;  %v554_v49 = vsub.f32 %v530_v38, %v1500_v51  ;;  %v454_v50 = vsub.f32 %v429_v39, %v1506_v54 }
  0xd7   : > { %v1173_v61 = vpop.eup %1172  ;;  %1184 = vpow2.f32 %v737_v31  ;;  %v757_v3 = vmul.f32 %v1171_v40, %v1563_v60  ;;  %v722_v31 = vsub.f32 0.0, %v587_v20 }
  0xd8   : > { %v719_v62 = vsub.f32 0.0, %v584_v46  ;;  %v570_v43 = vmul.f32 %v554_v49, %v554_v49  ;;  %v470_v63 = vmul.f32 %v454_v50, %v454_v50  ;;  %1186 = vpow2.f32 %v743_v41 }
  0xd9   : > { %v613_v54 = vpop.permute.xlu0 %612  ;;  %v1175_v57 = vpop.eup %1174  ;;  %v756_v8 = vmul.f32 %v1173_v61, %v1563_v60  ;;  %1188 = vpow2.f32 %v741_v0  ;;  %v753_v40 = vmul.f32 1.442695, %v722_v31 }
  0xda   : > { %v747_v51 = vmul.f32 1.442695, %v719_v62  ;;  %v586_v58 = vadd.f32 %v570_v43, %v470_v63  ;;  %v692_v44 = vmul.f32 %v1560_v59, %v613_v54  ;;  %v608_v4 = vpop.permute.xlu1 %607  ;;  %v1177_v9 = vpop.eup %1176  ;;  %v760_v17 = vmul.f32 %v1175_v57, %v1563_v60 }
  0xdb   : > { %v691_v7 = vmul.f32 %v1560_v59, %v608_v4  ;;  %v758_v21 = vmul.f32 %v1177_v9, %v1563_v60 }
  0xdc   : > { %v721_v10 = vsub.f32 0.0, %v586_v58  ;;  %v773_v11 = vadd.f32 %v757_v3, %v692_v44  ;;  %1190 = vpow2.f32 %v747_v51 }
  0xdd   : > { %v772_v13 = vadd.f32 %v756_v8, %v691_v7  ;;  %v628_v14 = vpop.permute.xlu0 %627  ;;  %v1179_v15 = vpop.eup %1178 }
  0xde   : > { %v751_v16 = vmul.f32 1.442695, %v721_v10  ;;  %789 = vst [vmem:[%s1571_s19 + $0x8] sm:$0xff] %v773_v11  ;;  %v695_v18 = vmul.f32 %v1560_v59, %v628_v14  ;;  %v618_v47 = vpop.permute.xlu1 %617  ;;  %v762_v26 = vmul.f32 %v1179_v15, %v1563_v60 }
  0xdf   : > { %788 = vst [vmem:[%s1571_s19] sm:$0xff] %v772_v13  ;;  %v693_v48 = vmul.f32 %v1560_v59, %v618_v47 }
  0xe0   : > { %v776_v22 = vadd.f32 %v760_v17, %v695_v18  ;;  %1192 = vpow2.f32 %v751_v16 }
  0xe1   : > { %v774_v23 = vadd.f32 %v758_v21, %v693_v48  ;;  %v638_v24 = vpop.permute.xlu0 %637  ;;  %v1181_v25 = vpop.eup %1180  ;;  %1194 = vpow2.f32 %v745_v12 }
  0xe2   : > { %792 = vst [vmem:[%s1571_s19 + $0x20] sm:$0xff] %v776_v22  ;;  %v697_v27 = vmul.f32 %v1560_v59, %v638_v24  ;;  %v623_v28 = vpop.permute.xlu1 %622  ;;  %v1183_v33 = vpop.eup %1182  ;;  %v764_v37 = vmul.f32 %v1181_v25, %v1563_v60  ;;  %1196 = vpow2.f32 %v749_v30 }
  0xe3   : > { %790 = vst [vmem:[%s1571_s19 + $0x10] sm:$0xff] %v774_v23  ;;  %v694_v32 = vmul.f32 %v1560_v59, %v623_v28  ;;  %v761_v46 = vmul.f32 %v1183_v33, %v1563_v60  ;;  %1198 = vpow2.f32 %v753_v40 }
  0xe4   : > { %v778_v34 = vadd.f32 %v762_v26, %v697_v27  ;;  %v1185_v35 = vpop.eup %1184 }
  0xe5   : > { %v775_v53 = vadd.f32 %v759_v29, %v694_v32  ;;  %v648_v36 = vpop.permute.xlu0 %647  ;;  %v1187_v52 = vpop.eup %1186  ;;  %v763_v1 = vmul.f32 %v1185_v35, %v1563_v60 }
  0xe6   : > { %794 = vst [vmem:[%s1571_s19 + $0x30] sm:$0xff] %v778_v34  ;;  %v699_v38 = vmul.f32 %v1560_v59, %v648_v36  ;;  %v633_v39 = vpop.permute.xlu1 %632  ;;  %v1189_v56 = vpop.eup %1188  ;;  %v766_v61 = vmul.f32 %v1187_v52, %v1563_v60 }
  0xe7   : > { %791 = vst [vmem:[%s1571_s19 + $0x18] sm:$0xff] %v775_v53  ;;  %v696_v41 = vmul.f32 %v1560_v59, %v633_v39  ;;  %v765_v5 = vmul.f32 %v1189_v56, %v1563_v60 }
  0xe8   : > { %v780_v49 = vadd.f32 %v764_v37, %v699_v38 }
  0xe9   : > { %v777_v50 = vadd.f32 %v761_v46, %v696_v41  ;;  %v658_v55 = vpop.permute.xlu0 %657  ;;  %v1191_v63 = vpop.eup %1190 }
  0xea   : > { %796 = vst [vmem:[%s1571_s19 + $0x40] sm:$0xff] %v780_v49  ;;  %v701_v62 = vmul.f32 %v1560_v59, %v658_v55  ;;  %v643_v43 = vpop.permute.xlu1 %642  ;;  %v768_v57 = vmul.f32 %v1191_v63, %v1563_v60 }
  0xeb   : > { %793 = vst [vmem:[%s1571_s19 + $0x28] sm:$0xff] %v777_v50  ;;  %v698_v0 = vmul.f32 %v1560_v59, %v643_v43 }
  0xec   : > { %v782_v2 = vadd.f32 %v766_v61, %v701_v62 }
  0xed   : > { %v779_v3 = vadd.f32 %v763_v1, %v698_v0  ;;  %v668_v54 = vpop.permute.xlu0 %667  ;;  %v1193_v44 = vpop.eup %1192 }
  0xee   : > { %798 = vst [vmem:[%s1571_s19 + $0x50] sm:$0xff] %v782_v2  ;;  %v703_v51 = vmul.f32 %v1560_v59, %v668_v54  ;;  %v653_v58 = vpop.permute.xlu1 %652  ;;  %v1195_v6 = vpop.eup %1194  ;;  %v770_v10 = vmul.f32 %v1193_v44, %v1563_v60 }
  0xef   : > { %795 = vst [vmem:[%s1571_s19 + $0x38] sm:$0xff] %v779_v3  ;;  %v700_v4 = vmul.f32 %v1560_v59, %v653_v58  ;;  %v767_v14 = vmul.f32 %v1195_v6, %v1563_v60  ;;  %v1197_v15 = vpop.eup %1196 }
  0xf0   : > { %v784_v7 = vadd.f32 %v768_v57, %v703_v51  ;;  %v769_v19 = vmul.f32 %v1197_v15, %v1563_v60  ;;  %v1199_v20 = vpop.eup %1198 }
  0xf1   : > { %v781_v8 = vadd.f32 %v765_v5, %v700_v4  ;;  %v678_v9 = vpop.permute.xlu0 %677  ;;  %v771_v23 = vmul.f32 %v1199_v20, %v1563_v60 }
  0xf2   : > { %800 = vst [vmem:[%s1571_s19 + $0x60] sm:$0xff] %v784_v7  ;;  %v705_v11 = vmul.f32 %v1560_v59, %v678_v9  ;;  %v663_v12 = vpop.permute.xlu1 %662 }
  0xf3   : > { %797 = vst [vmem:[%s1571_s19 + $0x48] sm:$0xff] %v781_v8  ;;  %v702_v13 = vmul.f32 %v1560_v59, %v663_v12 }
  0xf4   : > { %v786_v16 = vadd.f32 %v770_v10, %v705_v11 }
  0xf5   : > { %v783_v17 = vadd.f32 %v767_v14, %v702_v13 }
  0xf6   : > { %802 = vst [vmem:[%s1571_s19 + $0x70] sm:$0xff] %v786_v16  ;;  %v673_v18 = vpop.permute.xlu1 %672 }
  0xf7   : > { %799 = vst [vmem:[%s1571_s19 + $0x58] sm:$0xff] %v783_v17  ;;  %v704_v47 = vmul.f32 %v1560_v59, %v673_v18 }
  0xf9   : > { %v785_v21 = vadd.f32 %v769_v19, %v704_v47 }
  0xfa   : > { %v683_v48 = vpop.permute.xlu1 %682 }
  0xfb   : > { %801 = vst [vmem:[%s1571_s19 + $0x68] sm:$0xff] %v785_v21  ;;  %v706_v22 = vmul.f32 %v1560_v59, %v683_v48  ;;  %813 = sbr.rel (%p810_p1) target bundleno = 281 (0x119), region = 44 }
  0xfd   : > { %v787_v24 = vadd.f32 %v771_v23, %v706_v22 }
  0xff   : > { %803 = vst [vmem:[%s1571_s19 + $0x78] sm:$0xff] %v787_v24 }
 0x100   : > { %v1624_v25 = vstv %s1460_s6  ;;  %v849_v26 = vand.u32 127, %v436_v42  ;;  %v850_v27 = vstv %s1463_s9  ;;  %v816_v60 = vadd.s32 8, %v1489_v45  ;;  %v852_v33 = vld [vmem:[%s1571_s19] sm:$0xff]  ;;  %v853_v37 = vld [vmem:[%s1571_s19 + $0x8] sm:$0xff] }
 0x101   : > { %v832_v59 = vadd.s32 %v1624_v25, %v1489_v45  ;;  %v817_v28 = vadd.s32 16, %v1489_v45  ;;  %v818_v29 = vadd.s32 24, %v1489_v45  ;;  %v819_v31 = vadd.s32 32, %v1489_v45  ;;  %v854_v38 = vld [vmem:[%s1571_s19 + $0x10] sm:$0xff]  ;;  %v855_v39 = vld [vmem:[%s1571_s19 + $0x18] sm:$0xff]  ;;  %v856_v50 = vld [vmem:[%s1571_s19 + $0x20] sm:$0xff] }
 0x102   : > { %v1633_v30 = vadd.s32 %v850_v27, %v849_v26  ;;  %v820_v32 = vadd.s32 40, %v1489_v45  ;;  %v821_v42 = vadd.s32 48, %v1489_v45  ;;  %v833_v34 = vadd.s32 %v1624_v25, %v816_v60  ;;  %v857_v1 = vld [vmem:[%s1571_s19 + $0x28] sm:$0xff]  ;;  %v858_v2 = vld [vmem:[%s1571_s19 + $0x30] sm:$0xff]  ;;  %v859_v44 = vld [vmem:[%s1571_s19 + $0x38] sm:$0xff] }
 0x103   : > { %v834_v35 = vadd.s32 %v1624_v25, %v817_v28  ;;  %v835_v53 = vadd.s32 %v1624_v25, %v818_v29  ;;  %v822_v36 = vadd.s32 56, %v1489_v45  ;;  %v836_v52 = vadd.s32 %v1624_v25, %v819_v31  ;;  %v860_v13 = vld [vmem:[%s1571_s19 + $0x40] sm:$0xff]  ;;  %v861_v17 = vld [vmem:[%s1571_s19 + $0x48] sm:$0xff]  ;;  %v862_v21 = vld [vmem:[%s1571_s19 + $0x50] sm:$0xff] }
 0x104   : > { %vm868_vm0 = vcmp.eq.s32.totalorder %v832_v59, %v1633_v30  ;;  %v837_v40 = vadd.s32 %v1624_v25, %v820_v32  ;;  %v838_v41 = vadd.s32 %v1624_v25, %v821_v42  ;;  %v1296_v46 = vmov 0.0   ;;  %v863_v48 = vld [vmem:[%s1571_s19 + $0x58] sm:$0xff]  ;;  %v864_v27 = vld [vmem:[%s1571_s19 + $0x60] sm:$0xff]  ;;  %v865_v29 = vld [vmem:[%s1571_s19 + $0x68] sm:$0xff] }
 0x105   : > { %v884_v49 = vsel %vm868_vm0, 1e-08, %v1296_v46  ;;  %vm869_vm1 = vcmp.eq.s32.totalorder %v833_v34, %v1633_v30  ;;  %vm870_vm2 = vcmp.eq.s32.totalorder %v834_v35, %v1633_v30  ;;  %vm871_vm3 = vcmp.eq.s32.totalorder %v835_v53, %v1633_v30 }
 0x106   : > { %v900_v55 = vadd.f32 %v884_v49, %v852_v33  ;;  %v885_v56 = vsel %vm869_vm1, 1e-08, %v1296_v46  ;;  %v886_v61 = vsel %vm870_vm2, 1e-08, %v1296_v46  ;;  %v887_v62 = vsel %vm871_vm3, 1e-08, %v1296_v46 }
 0x107   : > { %v901_v43 = vadd.f32 %v885_v56, %v853_v37  ;;  %v902_v63 = vadd.f32 %v886_v61, %v854_v38  ;;  %v903_v0 = vadd.f32 %v887_v62, %v855_v39  ;;  %vm872_vm4 = vcmp.eq.s32.totalorder %v836_v52, %v1633_v30  ;;  %v866_v37 = vld [vmem:[%s1571_s19 + $0x70] sm:$0xff]  ;;  %v867_v52 = vld [vmem:[%s1571_s19 + $0x78] sm:$0xff] }
 0x108   : > { %916 = vst [vmem:[%s1571_s19] sm:$0xff] %v900_v55  ;;  %v888_v3 = vsel %vm872_vm4, 1e-08, %v1296_v46  ;;  %vm873_vm5 = vcmp.eq.s32.totalorder %v837_v40, %v1633_v30  ;;  %vm874_vm6 = vcmp.eq.s32.totalorder %v838_v41, %v1633_v30  ;;  %v839_v54 = vadd.s32 %v1624_v25, %v822_v36 }
 0x109   : > { %917 = vst [vmem:[%s1571_s19 + $0x8] sm:$0xff] %v901_v43  ;;  %918 = vst [vmem:[%s1571_s19 + $0x10] sm:$0xff] %v902_v63  ;;  %v904_v57 = vadd.f32 %v888_v3, %v856_v50  ;;  %v889_v51 = vsel %vm873_vm5, 1e-08, %v1296_v46  ;;  %v890_v58 = vsel %vm874_vm6, 1e-08, %v1296_v46 }
 0x10a   : > { %919 = vst [vmem:[%s1571_s19 + $0x18] sm:$0xff] %v903_v0  ;;  %v823_v4 = vadd.s32 64, %v1489_v45  ;;  %v905_v5 = vadd.f32 %v889_v51, %v857_v1  ;;  %v906_v6 = vadd.f32 %v890_v58, %v858_v2  ;;  %vm875_vm7 = vcmp.eq.s32.totalorder %v839_v54, %v1633_v30 }
 0x10b   : > { %v824_v7 = vadd.s32 72, %v1489_v45  ;;  %920 = vst [vmem:[%s1571_s19 + $0x20] sm:$0xff] %v904_v57  ;;  %v891_v8 = vsel %vm875_vm7, 1e-08, %v1296_v46  ;;  %v825_v10 = vadd.s32 80, %v1489_v45  ;;  %v826_v11 = vadd.s32 88, %v1489_v45 }
 0x10c   : > { %v840_v9 = vadd.s32 %v1624_v25, %v823_v4  ;;  %921 = vst [vmem:[%s1571_s19 + $0x28] sm:$0xff] %v905_v5  ;;  %922 = vst [vmem:[%s1571_s19 + $0x30] sm:$0xff] %v906_v6  ;;  %v907_v12 = vadd.f32 %v891_v8, %v859_v44  ;;  %v827_v15 = vadd.s32 96, %v1489_v45  ;;  %v828_v16 = vadd.s32 104, %v1489_v45 }
 0x10d   : > { %v841_v14 = vadd.s32 %v1624_v25, %v824_v7  ;;  %v842_v18 = vadd.s32 %v1624_v25, %v825_v10  ;;  %v843_v47 = vadd.s32 %v1624_v25, %v826_v11  ;;  %v829_v19 = vadd.s32 112, %v1489_v45 }
 0x10e   : > { %vm876_vm8 = vcmp.eq.s32.totalorder %v840_v9, %v1633_v30  ;;  %923 = vst [vmem:[%s1571_s19 + $0x38] sm:$0xff] %v907_v12  ;;  %v844_v22 = vadd.s32 %v1624_v25, %v827_v15  ;;  %v845_v23 = vadd.s32 %v1624_v25, %v828_v16  ;;  %v830_v53 = vadd.s32 120, %v1489_v45 }
 0x10f   : > { %v892_v20 = vsel %vm876_vm8, 1e-08, %v1296_v46  ;;  %vm877_vm9 = vcmp.eq.s32.totalorder %v841_v14, %v1633_v30  ;;  %vm878_vm10 = vcmp.eq.s32.totalorder %v842_v18, %v1633_v30  ;;  %vm879_vm11 = vcmp.eq.s32.totalorder %v843_v47, %v1633_v30 }
 0x110   : > { %v908_v24 = vadd.f32 %v892_v20, %v860_v13  ;;  %v893_v26 = vsel %vm877_vm9, 1e-08, %v1296_v46  ;;  %v894_v60 = vsel %vm878_vm10, 1e-08, %v1296_v46  ;;  %v895_v28 = vsel %vm879_vm11, 1e-08, %v1296_v46 }
 0x111   : > { %v909_v59 = vadd.f32 %v893_v26, %v861_v17  ;;  %vm880_vm12 = vcmp.eq.s32.totalorder %v844_v22, %v1633_v30  ;;  %v910_v31 = vadd.f32 %v894_v60, %v862_v21  ;;  %v911_v32 = vadd.f32 %v895_v28, %v863_v48 }
 0x112   : > { %924 = vst [vmem:[%s1571_s19 + $0x40] sm:$0xff] %v908_v24  ;;  %v896_v42 = vsel %vm880_vm12, 1e-08, %v1296_v46  ;;  %vm881_vm13 = vcmp.eq.s32.totalorder %v845_v23, %v1633_v30  ;;  %v846_v35 = vadd.s32 %v1624_v25, %v829_v19  ;;  %v847_v38 = vadd.s32 %v1624_v25, %v830_v53 }
 0x113   : > { %925 = vst [vmem:[%s1571_s19 + $0x48] sm:$0xff] %v909_v59  ;;  %v912_v33 = vadd.f32 %v896_v42, %v864_v27  ;;  %v897_v34 = vsel %vm881_vm13, 1e-08, %v1296_v46  ;;  %926 = vst [vmem:[%s1571_s19 + $0x50] sm:$0xff] %v910_v31 }
 0x114   : > { %927 = vst [vmem:[%s1571_s19 + $0x58] sm:$0xff] %v911_v32  ;;  %v913_v36 = vadd.f32 %v897_v34, %v865_v29  ;;  %vm882_vm14 = vcmp.eq.s32.totalorder %v846_v35, %v1633_v30  ;;  %vm883_vm15 = vcmp.eq.s32.totalorder %v847_v38, %v1633_v30 }
 0x115   : > { %928 = vst [vmem:[%s1571_s19 + $0x60] sm:$0xff] %v912_v33  ;;  %v898_v39 = vsel %vm882_vm14, 1e-08, %v1296_v46  ;;  %v899_v41 = vsel %vm883_vm15, 1e-08, %v1296_v46 }
 0x116   : > { %929 = vst [vmem:[%s1571_s19 + $0x68] sm:$0xff] %v913_v36  ;;  %v914_v40 = vadd.f32 %v898_v39, %v866_v37  ;;  %v915_v45 = vadd.f32 %v899_v41, %v867_v52 }
 0x118   : > { %930 = vst [vmem:[%s1571_s19 + $0x70] sm:$0xff] %v914_v40  ;;  %931 = vst [vmem:[%s1571_s19 + $0x78] sm:$0xff] %v915_v45 }
 0x119 PF: > { %s1728_s6 = scalar_lea.sflag [#allocation4], %s295_s18  ;;  %939 = sbr.rel (!%p1385_p3) target bundleno = 315 (0x13b), region = 48 }
 0x11a   : > { %s941_s9 = ssub.s32 (%p1385_p3), 38, %s1406_s13 }
 0x11b   : > { %p942_p4 = scmp.lt.s32.totalorder (%p1385_p3), %s941_s9, 16 }
 0x11e   : > { %s1824_s9 = smov (!%p942_p4, %s941_s9), 16 }
 0x11f   : > { %s1733_s14 = sshll.u32 %s1824_s9, 7 }
 0x120   : > { %s946_s15 = ssub.s32 2048, %s1733_s14 }
 0x121   : > { %947 = vsyncadd %s1728_s6, %s946_s15  ;;  %p1079_p5 = scmp.ne.s32.totalorder %s1733_s14, 0  ;;  %s1086_s0 = smul.u32 48, %s1280_s24 }
 0x122   : > { %s954_s7 = sshll.u32 %s1571_s19, 4  ;;  %s1297_s16 = smov [#allocation3]   ;;  %s1741_s7 = int_to_ptr.vmem [resolvable:$true] %s954_s7 }
 0x123   : > { %s950_s28 = sadd.s32 %s1276_s23, %s1086_s0  ;;  %s1200_s18 = scalar_lea.vmem %s1741_s7, %s1733_s14 }
 0x124   : > { %s1081_s13 = sshll.u32 %s950_s28, 7  ;;  %p1201_p3 = scmp.ne.s32.totalorder %s1741_s7, %s1200_s18 }
 0x125   : > { %s1746_s17 = scalar_lea.hbm %s1805_s5, %s1081_s13  ;;  %s1204_s24 = sshll.u32 %s1297_s16, 4  ;;  %s1205_s24 = int_to_ptr.vmem [resolvable:$false] %s1204_s24 }
 0x126   : > { %p1202_p6 = pnand %p1201_p3, %p1079_p5  ;;  %s1206_s23 = scalar_lea.vmem %s1205_s24, 4096 }
 0x127   : > { %p1207_p9 = scmp.lt.s32.totalorder %s1741_s7, %s1205_s24  ;;  %p1208_p10 = scmp.lt.s32.totalorder %s1206_s23, %s1200_s18 }
 0x128   : > { %p1203_p7 = pneg %p1202_p6 }
 0x129   : > { %p1209_p11 = por %p1208_p10, %p1207_p9 }
 0x12b   : > { %p1210_p12 = pnand %p1209_p11, %p1203_p7 }
 0x12d   : > { %1213 = shalt.err (!%p1210_p12)
}
 0x12e   : > { %s1214_s19 = scalar_lea.hbm %s1746_s17, %s1733_s14  ;;  %s1218_s0 = scalar_lea.hbm %s1805_s5, 14592 }
 0x12f   : > { %p1215_p13 = scmp.ne.s32.totalorder %s1746_s17, %s1214_s19  ;;  %p1219_p2 = scmp.lt.s32.totalorder %s1746_s17, %s1805_s5 }
 0x130   : > { %p1220_p4 = scmp.lt.s32.totalorder %s1218_s0, %s1214_s19 }
 0x131   : > { %p1216_p0 = pnand %p1215_p13, %p1079_p5 }
 0x132   : > { %p1221_p3 = por %p1220_p4, %p1219_p2 }
 0x133   : > { %p1217_p1 = pneg %p1216_p0 }
 0x135   : > { %p1222_p6 = pnand %p1221_p3, %p1217_p1 }
 0x137   : > { %1225 = shalt.err (!%p1222_p6)
}
 0x138   : > { %s1298_s10 = smov 128   ;;  %s1299_s11 = smov 384  }
 0x139   : > { %s1300_s18 = smov 8  }
 0x13a   : > { %960 = dma.vmem_to_hbm [thread:$0]  (%p1079_p5), %s1741_s7, %s1733_s14, %s1746_s17, %s1728_s6, %s1298_s10, %s1299_s11, %s1300_s18  }
 0x13b PF: > { %p1092_p7 = scmp.ge.s32.totalorder %s1292_s27, 2  ;;  %s969_s16 = sand.u32 1, %s1264_s20  }
 0x13c   : > { %s970_s24 = scalar_lea.sflag [#allocation4], %s969_s16 }
 0x13d   : > { %p1089_p9 = pnand %p1092_p7, %p1394_p8 }
 0x13f   : > { %p1090_p10 = pneg %p1089_p9 }
 0x141   : > { %1259 = dma.done.wait (%p1090_p10), %s970_s24, 2048  }
 0x142   : > { %1261 = vsyncadd (%p1090_p10), %s970_s24, 4294965248  ;;  %s19_s27 = sadd.s32 1, %s1292_s27   ;;  %s1810_s20 = smov %s1268_s21 }
 0x143   : > { %p16_p11 = scmp.ge.s32.totalorder %s19_s27, 11   ;;  %s1811_s21 = smov %s1272_s22 }
 0x144   : > { %s1812_s22 = smov %s1403_s12  ;;  %s1813_s23 = smov %s1284_s25 }
 0x145   : > { %s1814_s24 = smov %s1288_s26  ;;  %s1815_s25 = smov %s1818_s29 }
 0x146   : > { %s1816_s26 = smov %s1822_s30  ;;  %18 = sbr.rel (!%p16_p11) target bundleno = 7 (0x7), region = 88 }
 0x14b   :  { %975 = vsyncpa [#allocation4], 1 }
 0x14c   :  { %977 = vsyncpa [#allocation4 + $0x1], 1 }

</bundles_post_ra>
